<compile_context>
chip_gen: v7x
topology: tpu7x:2x2x1
jax: 0.10.0
libtpu: 0.0.40
codegen_flags: <defaults>
</compile_context>

<pallas_src>
import functools

import numpy as np
import jax
import jax.numpy as jnp
from jax.experimental import pallas as pl
from jax.experimental.pallas import tpu as pltpu

EPS = 1e-5  # nn.BatchNorm2d default eps


def conv_bn_relu_kernel(slab_ref, w_ref, mask_ref, gamma_ref, beta_ref, o_ref,
                        *, inv_n):
    # slab_ref:  (Kp, P)   im2col slab, row = (ci, kh, kw) tap, zero-padded to Kp
    # w_ref:     (Cp, Kp)  flattened conv weights, zero-padded to (Cp, Kp)
    # mask_ref:  (1, P)    1.0 on valid conv-output lanes, 0.0 on border lanes
    # gamma_ref: (Cp, 1), beta_ref: (Cp, 1)  (zero-padded past Cout)
    # o_ref:     (Cp, P)
    # --- convolution: single MXU matmul over the folded K = Cin*KH*KW axis ---
    acc = jnp.dot(w_ref[...], slab_ref[...],
                  preferred_element_type=jnp.float32)           # (Cp, P)
    # (conv bias intentionally omitted: it cancels against the BN mean subtraction)

    # --- BatchNorm2d, training-mode batch stats (biased variance), single pass ---
    vf = mask_ref[...]                                          # (1, P)
    masked = acc * vf
    s1 = jnp.sum(masked, axis=1, keepdims=True)                 # (Cp, 1)
    s2 = jnp.sum(masked * acc, axis=1, keepdims=True)           # (Cp, 1)
    mean = s1 * inv_n
    var = s2 * inv_n - mean * mean
    y = (acc - mean) * jax.lax.rsqrt(var + EPS)
    y = y * gamma_ref[...] + beta_ref[...]

    # --- ReLU + lane-dense, sublane-unmasked store ---
    o_ref[...] = jnp.maximum(y, 0.0).astype(o_ref.dtype)
    # TODO(synk): running_mean/running_var momentum update is a training-time
    # side effect with no effect on the returned tensor; not materialized here.


@jax.jit
def model_forward(x_nchw, w_oihw, bias, gamma, beta):
    del bias  # per-channel conv bias cancels exactly with training-mode BN mean subtraction
    N, Cin, H, W = x_nchw.shape
    Cout, _, KH, KW = w_oihw.shape
    OH, OW = H - KH + 1, W - KW + 1          # VALID conv (nn.Conv2d default padding=0)
    P = N * H * W
    K = Cin * KH * KW
    Cp = 8                                    # sublane-pad output channels 3 -> 8
    Kp = ((K + 7) // 8) * 8                   # sublane-pad folded K 27 -> 32
    inv_n = 1.0 / float(N * OH * OW)

    # ---- wrapper glue (fused by jit): im2col slab (Kp, P), lane = n*H*W + h*W + w ----
    max_off = (KH - 1) * W + (KW - 1)
    x_lin = jnp.transpose(x_nchw, (1, 0, 2, 3)).reshape(Cin, P).astype(jnp.float32)
    x_pad = jnp.pad(x_lin, ((0, 0), (0, max_off)))
    taps = [x_pad[:, kh * W + kw: kh * W + kw + P]
            for kh in range(KH) for kw in range(KW)]            # KH*KW x (Cin, P)
    slab = jnp.stack(taps, axis=1).reshape(K, P)                # rows ordered (ci, kh, kw)
    slab = jnp.pad(slab, ((0, Kp - K), (0, 0)))

    w_mat = w_oihw.reshape(Cout, K).astype(jnp.float32)
    w_mat = jnp.pad(w_mat, ((0, Cp - Cout), (0, Kp - K)))
    gamma_p = jnp.pad(gamma.astype(jnp.float32), (0, Cp - Cout)).reshape(Cp, 1)
    beta_p = jnp.pad(beta.astype(jnp.float32), (0, Cp - Cout)).reshape(Cp, 1)

    # static validity mask, built host-side (becomes a jit constant)
    lane = np.arange(P)
    rem = lane % (H * W)
    valid = ((rem // W) < OH) & ((rem % W) < OW)
    mask = jnp.asarray(valid.astype(np.float32)).reshape(1, P)

    kernel = functools.partial(conv_bn_relu_kernel, inv_n=inv_n)
    vmem = pl.BlockSpec(memory_space=pltpu.MemorySpace.VMEM)
    # NOTE: the whole problem is ~80 KiB of VMEM, so a single grid-less
    # invocation is used.  If scaled to large N/H/W: grid over the lane axis
    # with dimension_semantics=("parallel", ..., "arbitrary") so both v7x
    # TensorCores are used, accumulate per-channel sum/sumsq across the
    # "arbitrary" axis (two-pass BN), and size tiles so
    # 2 inputs x 2 double-buffers x tile stays under v7x's 32 MiB default
    # scoped VMEM (64 MiB physical).
    out = pl.pallas_call(
        kernel,
        out_shape=jax.ShapeDtypeStruct((Cp, P), jnp.float32),
        in_specs=[vmem] * 5,
        out_specs=vmem,
    )(slab, w_mat, mask, gamma_p, beta_p)

    # (Cp, P) -> drop padded channels + invalid border -> leading-dim swap to NCHW
    y = out[:Cout].reshape(Cout, N, H, W)[:, :, :OH, :OW]
    return jnp.transpose(y, (1, 0, 2, 3))


def reference_forward(x_nchw, w_oihw, bias, gamma, beta):
    conv = jax.lax.conv_general_dilated(
        x_nchw, w_oihw, window_strides=(1, 1), padding="VALID",
        dimension_numbers=("NCHW", "OIHW", "NCHW"))
    conv = conv + bias[None, :, None, None]
    mean = jnp.mean(conv, axis=(0, 2, 3), keepdims=True)
    var = jnp.mean(jnp.square(conv - mean), axis=(0, 2, 3), keepdims=True)
    y = (conv - mean) * jax.lax.rsqrt(var + EPS)
    y = y * gamma[None, :, None, None] + beta[None, :, None, None]
    return jnp.maximum(y, 0.0)


if __name__ == "__main__":
    key = jax.random.PRNGKey(0)
    kx, kw, kb, kg, kbt = jax.random.split(key, 5)

    N, Cin, H, W = 2, 3, 16, 16          # module fixes Cin = 3
    Cout, KH, KW = 3, 3, 3               # nn.Conv2d(3, 3, 3)

    # deterministic synthetic parameters (shapes from the module __init__)
    x = jax.random.normal(kx, (N, Cin, H, W), jnp.float32)
    w = jax.random.normal(kw, (Cout, Cin, KH, KW), jnp.float32) * 0.2
    b = jax.random.normal(kb, (Cout,), jnp.float32) * 0.1
    gamma = 1.0 + 0.1 * jax.random.normal(kg, (Cout,), jnp.float32)
    beta = 0.1 * jax.random.normal(kbt, (Cout,), jnp.float32)

    out = jax.block_until_ready(model_forward(x, w, b, gamma, beta))

    ref = reference_forward(x, w, b, gamma, beta)
    assert out.shape == (N, Cout, H - KH + 1, W - KW + 1)
    assert bool(jnp.allclose(out, ref, atol=1e-4, rtol=1e-4))
    print("KERNEL_OK")
</pallas_src>

<mosaic_0001>
module attributes {stable_mosaic.version = 11 : i64} {
  func.func @conv_bn_relu_kernel(%arg0: memref<32x512xf32, #tpu.memory_space<vmem>>, %arg1: memref<8x32xf32, #tpu.memory_space<vmem>>, %arg2: memref<1x512xf32, #tpu.memory_space<vmem>>, %arg3: memref<8x1xf32, #tpu.memory_space<vmem>>, %arg4: memref<8x1xf32, #tpu.memory_space<vmem>>, %arg5: memref<8x512xf32, #tpu.memory_space<vmem>>) attributes {dimension_semantics = [], scalar_prefetch = 0 : i64, scratch_operands = 0 : i64, tpu.core_type = #tpu.core_type<tc>} {
    %c0 = arith.constant 0 : index
    %c0_0 = arith.constant 0 : index
    %0 = vector.load %arg1[%c0, %c0_0] : memref<8x32xf32, #tpu.memory_space<vmem>>, vector<8x32xf32>
    %c0_1 = arith.constant 0 : index
    %c0_2 = arith.constant 0 : index
    %1 = vector.load %arg0[%c0_1, %c0_2] : memref<32x512xf32, #tpu.memory_space<vmem>>, vector<32x512xf32>
    %cst = arith.constant dense<0.000000e+00> : vector<8x512xf32>
    %2 = tpu.matmul %0, %1, %cst {dimension_numbers = #tpu.dot_dimension_numbers<[1], [0], [0], [1], [0, 0, 1, 1], [], []>} : vector<8x32xf32>, vector<32x512xf32>, vector<8x512xf32> -> vector<8x512xf32>
    %c0_3 = arith.constant 0 : index
    %c0_4 = arith.constant 0 : index
    %3 = vector.load %arg2[%c0_3, %c0_4] : memref<1x512xf32, #tpu.memory_space<vmem>>, vector<1x512xf32>
    %4 = vector.broadcast %3 : vector<1x512xf32> to vector<8x512xf32>
    %5 = arith.mulf %2, %4 : vector<8x512xf32>
    %cst_5 = arith.constant dense<0.000000e+00> : vector<8xf32>
    %6 = vector.multi_reduction <add>, %5, %cst_5 [1] : vector<8x512xf32> to vector<8xf32>
    %7 = vector.shape_cast %6 : vector<8xf32> to vector<8x1xf32>
    %8 = arith.mulf %5, %2 : vector<8x512xf32>
    %cst_6 = arith.constant dense<0.000000e+00> : vector<8xf32>
    %9 = vector.multi_reduction <add>, %8, %cst_6 [1] : vector<8x512xf32> to vector<8xf32>
    %10 = vector.shape_cast %9 : vector<8xf32> to vector<8x1xf32>
    %cst_7 = arith.constant 0.00255102036 : f32
    %11 = vector.broadcast %cst_7 : f32 to vector<8x1xf32>
    %12 = arith.mulf %7, %11 : vector<8x1xf32>
    %cst_8 = arith.constant 0.00255102036 : f32
    %13 = vector.broadcast %cst_8 : f32 to vector<8x1xf32>
    %14 = arith.mulf %10, %13 : vector<8x1xf32>
    %15 = arith.mulf %12, %12 : vector<8x1xf32>
    %16 = arith.subf %14, %15 : vector<8x1xf32>
    %17 = vector.broadcast %12 : vector<8x1xf32> to vector<8x512xf32>
    %18 = arith.subf %2, %17 : vector<8x512xf32>
    %cst_9 = arith.constant 9.99999974E-6 : f32
    %19 = vector.broadcast %cst_9 : f32 to vector<8x1xf32>
    %20 = arith.addf %16, %19 : vector<8x1xf32>
    %21 = math.rsqrt %20 : vector<8x1xf32>
    %22 = vector.broadcast %21 : vector<8x1xf32> to vector<8x512xf32>
    %23 = arith.mulf %18, %22 : vector<8x512xf32>
    %c0_10 = arith.constant 0 : index
    %c0_11 = arith.constant 0 : index
    %24 = vector.load %arg3[%c0_10, %c0_11] : memref<8x1xf32, #tpu.memory_space<vmem>>, vector<8x1xf32>
    %25 = vector.broadcast %24 : vector<8x1xf32> to vector<8x512xf32>
    %26 = arith.mulf %23, %25 : vector<8x512xf32>
    %c0_12 = arith.constant 0 : index
    %c0_13 = arith.constant 0 : index
    %27 = vector.load %arg4[%c0_12, %c0_13] : memref<8x1xf32, #tpu.memory_space<vmem>>, vector<8x1xf32>
    %28 = vector.broadcast %27 : vector<8x1xf32> to vector<8x512xf32>
    %29 = arith.addf %26, %28 : vector<8x512xf32>
    %cst_14 = arith.constant 0.000000e+00 : f32
    %30 = vector.broadcast %cst_14 : f32 to vector<8x512xf32>
    %31 = arith.maximumf %29, %30 : vector<8x512xf32>
    %c0_15 = arith.constant 0 : index
    %c0_16 = arith.constant 0 : index
    %32 = vector.load %arg5[%c0_15, %c0_16] : memref<8x512xf32, #tpu.memory_space<vmem>>, vector<8x512xf32>
    tpu.vector_store %arg5[%c0_15, %c0_16], %31 {strides = array<i32>} : memref<8x512xf32, #tpu.memory_space<vmem>>, vector<8x512xf32>,
    return
  }
}

</mosaic_0001>

<bundles_post_ra>
// kernel: model_forward.1
= control target key start
LH: loop header
LB: loop body
LE: loop exit
PB: predicated region body
PF: predicated region fallthrough
CT: control target
= control target key end

     0   :  { %v293_v3 = vmov 0.0   ;;  %vm37_vm0 = vcmask 261120   ;;  %v294_v26 = vmov 0   ;;  %v185_v29 = vlaneseq  ;;  %s397_s0 = inlined_call_operand.vmem [shape: f32[32,512], index: 0, kind: input, shape index: {}]   ;;  %s398_s1 = inlined_call_operand.vmem [shape: f32[8,32], index: 1, kind: input, shape index: {}]   ;;  %s399_s3 = inlined_call_operand.vmem [shape: f32[8,1], index: 3, kind: input, shape index: {}]   ;;  %s400_s4 = inlined_call_operand.vmem [shape: f32[8,1], index: 4, kind: input, shape index: {}]   ;;  %s401_s2 = inlined_call_operand.vmem [shape: f32[1,512], index: 2, kind: input, shape index: {}]   ;;  %s402_s5 = inlined_call_operand.vmem [shape: f32[8,512], index: 5, kind: output, shape index: {}]  }
   0x1   :  { %v22_v0 = vld [vmem:[%s397_s0 + $0x8] sm:$0xff]  ;;  %v24_v2 = vld [vmem:[%s397_s0 + $0x18] sm:$0xff]  ;;  %105 = vmatprep.mubr.f32.mxu0 %v293_v3  ;;  %176 = vmatprep.mubr.f32.mxu1 %v293_v3  ;;  %v21_v6 = vld [vmem:[%s397_s0] sm:$0xff] }
   0x2   :  { %v26_v1 = vld [vmem:[%s397_s0 + $0x28] sm:$0xff]  ;;  %v28_v5 = vld [vmem:[%s397_s0 + $0x38] sm:$0xff]  ;;  %v25_v7 = vld [vmem:[%s397_s0 + $0x20] sm:$0xff]  ;;  %289 = vset.pattern.permute.xlu1 %v294_v26  ;;  %290 = vset.pattern.permute.xlu0 %v294_v26  ;;  %v186_v30 = vshrl.u32 %v185_v29, 7 }
   0x3   :  { %v271_v4 = vpack.c.bf16 %v26_v1, %v22_v0  ;;  %v279_v8 = vpack.c.bf16 %v28_v5, %v24_v2  ;;  %v273_v9 = vpack.c.bf16 %v25_v7, %v21_v6  ;;  %v23_v10 = vld [vmem:[%s397_s0 + $0x10] sm:$0xff]  ;;  %v30_v12 = vld [vmem:[%s397_s0 + $0x48] sm:$0xff]  ;;  %v32_v15 = vld [vmem:[%s397_s0 + $0x58] sm:$0xff] }
   0x4   :  { %v27_v11 = vld [vmem:[%s397_s0 + $0x30] sm:$0xff]  ;;  %v34_v14 = vld [vmem:[%s397_s0 + $0x68] sm:$0xff]  ;;  %v36_v16 = vld [vmem:[%s397_s0 + $0x78] sm:$0xff]  ;;  %v187_v31 = vsub.s32 0, %v186_v30  ;;  %v195_v33 = vsub.s32 2, %v186_v30  ;;  %v191_v34 = vsub.s32 1, %v186_v30 }
   0x5   :  { %272 = vmatprep.subr.bf16.mxu0 %v271_v4  ;;  %v281_v13 = vpack.c.bf16 %v27_v11, %v23_v10  ;;  %280 = vmatprep.subr.bf16.mxu1 %v279_v8  ;;  %v275_v17 = vpack.c.bf16 %v34_v14, %v30_v12  ;;  %v283_v18 = vpack.c.bf16 %v36_v16, %v32_v15  ;;  %v29_v19 = vld [vmem:[%s397_s0 + $0x40] sm:$0xff]  ;;  %v31_v21 = vld [vmem:[%s397_s0 + $0x50] sm:$0xff]  ;;  %v199_v35 = vsub.s32 3, %v186_v30 }
   0x6   :  { %274 = vmatpush1.bf16.msra.mxu0 %v273_v9  ;;  %v33_v20 = vld [vmem:[%s397_s0 + $0x60] sm:$0xff]  ;;  %v35_v23 = vld [vmem:[%s397_s0 + $0x70] sm:$0xff] }
   0x7   :  { %282 = vmatpush1.bf16.msra.mxu1 %v281_v13  ;;  %v277_v22 = vpack.c.bf16 %v33_v20, %v29_v19  ;;  %276 = vmatprep.subr.bf16.mxu0 %v275_v17  ;;  %v285_v24 = vpack.c.bf16 %v35_v23, %v31_v21  ;;  %v20_v25 = vld [vmem:[%s398_s1] sm:$0xff] }
   0x8   :  { %284 = vmatprep.subr.bf16.mxu1 %v283_v18  ;;  %v237_v27 = vld [vmem:[%s399_s3] sm:$0xff] }
   0x9   :  { %240 = vperm.xlu1 %289, %v237_v27   ;;  %v247_v28 = vld [vmem:[%s400_s4] sm:$0xff] }
   0xa   :  { %278 = vmatpush1.bf16.msra.mxu0 %v277_v22  ;;  %v183_v32 = vld [vmem:[%s401_s2] sm:$0xf] }
   0xb   :  { %286 = vmatpush1.bf16.msra.mxu1 %v285_v24  ;;  %v188_v36 = vrot.slane %v183_v32, %v187_v31  ;;  %v196_v37 = vrot.slane %v183_v32, %v195_v33  ;;  %v192_v38 = vrot.slane %v183_v32, %v191_v34  ;;  %v200_v40 = vrot.slane %v183_v32, %v199_v35 }
   0xd   :  { %269 = vmatmul.mubr.msk.f32.vlgmr.msra.gmra.mrb[0].mxu0 %vm37_vm0, %v20_v25  ;;  %250 = vperm.xlu1 %289, %v247_v28  }
   0xe   :  { %270 = vmatmul.mubr.msk.f32.vlgmr.msra.gmra.mrb[0].mxu1 %vm37_vm0, %v20_v25 }
  0x88   :  { %v241_v1 = vpop.permute.xlu1 %240 }
  0x8c   :  { %v251_v15 = vpop.permute.xlu1 %250 }
  0xe0   :  { %v107_v39 = vpop.f32.mrb[0].mxu0 }
  0xe1   :  { %v205_v41 = vmul.f32 %v188_v36, %v107_v39  ;;  %v178_v42 = vpop.f32.mrb[0].mxu1  ;;  %v109_v43 = vpop.f32.mrb[1].mxu0 }
  0xe2   :  { %v207_v44 = vmul.f32 %v196_v37, %v178_v42  ;;  %v206_v45 = vmul.f32 %v192_v38, %v109_v43  ;;  %v180_v46 = vpop.f32.mrb[1].mxu1 }
  0xe3   :  { %v214_v47 = vmul.f32 %v205_v41, %v107_v39  ;;  %v208_v50 = vmul.f32 %v200_v40, %v180_v46 }
  0xe4   :  { %v209_v48 = vadd.f32 %v206_v45, %v205_v41  ;;  %v215_v49 = vmul.f32 %v206_v45, %v109_v43  ;;  %v216_v51 = vmul.f32 %v207_v44, %v178_v42 }
  0xe5   :  { %v217_v54 = vmul.f32 %v208_v50, %v180_v46 }
  0xe6   :  { %v218_v52 = vadd.f32 %v215_v49, %v214_v47  ;;  %v210_v53 = vadd.f32 %v209_v48, %v207_v44 }
  0xe8   :  { %v211_v55 = vadd.f32 %v210_v53, %v208_v50  ;;  %v219_v56 = vadd.f32 %v218_v52, %v216_v51 }
  0xea   :  { %212 = vadd.xlane.f32.xlu0 %v211_v55  ;;  %v220_v57 = vadd.f32 %v219_v56, %v217_v54 }
  0xee   :  { %221 = vadd.xlane.f32.xlu0 %v220_v57 }
 0x177   :  { %v213_v58 = vpop.xlane.xlu0 %212 }
 0x178   :  { %v223_v59 = vmul.f32 0.0025510204, %v213_v58 }
 0x17a   :  { %v225_v61 = vmul.f32 %v223_v59, %v223_v59  ;;  %v227_v2 = vsub.f32 %v107_v39, %v223_v59  ;;  %v228_v3 = vsub.f32 %v109_v43, %v223_v59  ;;  %v229_v4 = vsub.f32 %v178_v42, %v223_v59 }
 0x17b   :  { %v222_v60 = vpop.xlane.xlu0 %221  ;;  %v230_v5 = vsub.f32 %v180_v46, %v223_v59 }
 0x17c   :  { %v224_v62 = vmul.f32 0.0025510204, %v222_v60 }
 0x17e   :  { %v226_v63 = vsub.f32 %v224_v62, %v225_v61 }
 0x180   :  { %v231_v0 = vadd.f32 1e-05, %v226_v63 }
 0x182   :  { %291 = vrsqrt.f32 %v231_v0 }
 0x18c   :  { %v292_v6 = vpop.eup %291 }
 0x18d   :  { %v233_v7 = vmul.f32 %v292_v6, %v227_v2  ;;  %v234_v8 = vmul.f32 %v292_v6, %v228_v3  ;;  %v235_v9 = vmul.f32 %v292_v6, %v229_v4  ;;  %v236_v10 = vmul.f32 %v292_v6, %v230_v5 }
 0x18f   :  { %v243_v11 = vmul.f32 %v241_v1, %v233_v7  ;;  %v244_v12 = vmul.f32 %v241_v1, %v234_v8  ;;  %v245_v13 = vmul.f32 %v241_v1, %v235_v9  ;;  %v246_v14 = vmul.f32 %v241_v1, %v236_v10 }
 0x191   :  { %v253_v16 = vadd.f32 %v251_v15, %v243_v11  ;;  %v254_v17 = vadd.f32 %v251_v15, %v244_v12  ;;  %v255_v18 = vadd.f32 %v251_v15, %v245_v13  ;;  %v256_v19 = vadd.f32 %v251_v15, %v246_v14 }
 0x193   :  { %v257_v20 = vmax.f32 %v253_v16, 0.0  ;;  %v258_v21 = vmax.f32 %v254_v17, 0.0  ;;  %v259_v22 = vmax.f32 %v255_v18, 0.0  ;;  %v260_v23 = vmax.f32 %v256_v19, 0.0 }
 0x195   :  { %261 = vst [vmem:[%s402_s5] sm:$0xff] %v257_v20  ;;  %262 = vst [vmem:[%s402_s5 + $0x8] sm:$0xff] %v258_v21 }
 0x196   :  { %263 = vst [vmem:[%s402_s5 + $0x10] sm:$0xff] %v259_v22  ;;  %264 = vst [vmem:[%s402_s5 + $0x18] sm:$0xff] %v260_v23 }

</bundles_post_ra>
